<compile_context>
chip_gen: v6e
topology: v6e:2x2x1
jax: 0.10.0
libtpu: 0.0.40
codegen_flags: <defaults>
</compile_context>

<pallas_src>
import functools

import numpy as np
import jax
import jax.numpy as jnp
from jax.experimental import pallas as pl
from jax.experimental.pallas import tpu as pltpu


def _bilinear_interp_matrix(in_size: int, out_size: int) -> jnp.ndarray:
    """Dense (out_size, in_size) matrix reproducing PyTorch F.interpolate
    mode='bilinear', align_corners=False along one axis (no antialias)."""
    scale = in_size / out_size
    dst = np.arange(out_size, dtype=np.float64)
    src = scale * (dst + 0.5) - 0.5
    src = np.maximum(src, 0.0)                       # PyTorch clamps negative source coords
    x0 = np.minimum(np.floor(src).astype(np.int64), in_size - 1)
    x1 = np.minimum(x0 + 1, in_size - 1)
    lam = src - x0
    W = np.zeros((out_size, in_size), dtype=np.float32)
    W[np.arange(out_size), x0] += (1.0 - lam).astype(np.float32)
    W[np.arange(out_size), x1] += lam.astype(np.float32)
    return jnp.asarray(W)


def _injection_kernel(xl_ref, xg_ref, mT_ref, wl_ref, bl_ref, wag_ref, bag_ref, o_ref,
                      *, D, nb):
    # xl_ref : (nb, C_in, Sl)   local features, spatial flattened (lane-dense)
    # xg_ref : (nb, D,    Sg)   global features, spatial flattened
    # mT_ref : (Sg, Sl)         kron(wh, ww).T  -> full 2-D bilinear interp as one matmul
    # wl_ref : (D, C_in)        fused local 1x1 conv + BN weight
    # bl_ref : (D, 1)           fused local bias
    # wag_ref: (2D, D)          [global_act ; global_embedding] fused weights stacked
    # bag_ref: (2D, 1)          stacked fused biases
    # o_ref  : (nb, D, Sl)      output, lane-dense spatial axis
    mT = mT_ref[...]
    wl = wl_ref[...]
    bl = bl_ref[...]
    wag = wag_ref[...]
    bag = bag_ref[...]

    for i in range(nb):  # static unroll over the batch sub-block
        xl = xl_ref[i]                                                    # (C_in, Sl)
        xg = xg_ref[i]                                                    # (D,    Sg)

        # local_embedding: (D, C_in) @ (C_in, Sl) + b   (f32 accumulation on MXU)
        local = jnp.dot(wl, xl, preferred_element_type=jnp.float32) + bl  # (D, Sl)

        # global_act + global_embedding in one channel matmul: (2D, D) @ (D, Sg) + b
        ag = jnp.dot(wag, xg, preferred_element_type=jnp.float32) + bag   # (2D, Sg)

        # h_sigmoid only on the first D rows (global_act half), passthrough for the rest.
        # select instead of concat/slice -> no VMEM materialization of two halves.
        rows = jax.lax.broadcasted_iota(jnp.int32, ag.shape, 0)
        hsig = jnp.clip(ag + 3.0, 0.0, 6.0) * (1.0 / 6.0)
        stacked = jnp.where(rows < D, hsig, ag)                           # (2D, Sg)

        # One interpolation matmul for BOTH tensors: (2D, Sg) @ (Sg, Sl).
        interp = jnp.dot(stacked.astype(mT.dtype), mT,
                         preferred_element_type=jnp.float32)              # (2D, Sl)
        sig_up = interp[:D]                                               # (D, Sl)
        feat_up = interp[D:]                                              # (D, Sl)

        o_ref[i] = (local * sig_up + feat_up).astype(o_ref.dtype)


def injection_multi_sum(x_l, x_g, w_local, b_local, w_gact, b_gact, w_gemb, b_gemb,
                        *, nb=1, compute_dtype=jnp.float32):
    """x_l: (N, C_in, Hl, Wl); x_g: (N, D, Hg, Wg).
    w_*/b_* are the 1x1-conv weights with eval-mode BatchNorm already fused in
    (weight (out, in), bias (out,)). Pass w_local=None for the inp==oup Identity branch."""
    N, C_in, Hl, Wl = x_l.shape
    N2, D, Hg, Wg = x_g.shape
    assert N2 == N and w_gact.shape == (D, D) and w_gemb.shape == (D, D)
    assert N % nb == 0
    Sl, Sg = Hl * Wl, Hg * Wg

    if w_local is None:  # inp == oup -> local_embedding = nn.Identity()
        w_local = jnp.eye(D, dtype=jnp.float32)
        b_local = jnp.zeros((D,), dtype=jnp.float32)

    # Combined separable bilinear interpolation matrix: kron(wh, ww) so the whole 2-D
    # interpolation is a single MXU matmul.
    # TODO(synk): for large spatial sizes replace the kron matrix with a separable
    # width-then-height matmul pair to bound the (Sg, Sl) matrix size / VMEM use.
    wh = _bilinear_interp_matrix(Hg, Hl)                        # (Hl, Hg)
    ww = _bilinear_interp_matrix(Wg, Wl)                        # (Wl, Wg)
    mT = jnp.kron(wh, ww).T.astype(compute_dtype)               # (Sg, Sl)

    # Lane-dense flattened spatial axes.
    xl_f = x_l.reshape(N, C_in, Sl).astype(compute_dtype)
    xg_f = x_g.reshape(N, D, Sg).astype(compute_dtype)

    # Stack global_act / global_embedding convs into one operand.
    w_ag = jnp.concatenate([w_gact, w_gemb], axis=0).astype(compute_dtype)        # (2D, D)
    b_ag = jnp.concatenate([b_gact, b_gemb], axis=0).reshape(2 * D, 1).astype(jnp.float32)
    w_l = w_local.astype(compute_dtype)                                           # (D, C_in)
    b_l = b_local.reshape(D, 1).astype(jnp.float32)

    kernel = functools.partial(_injection_kernel, D=D, nb=nb)

    out_flat = pl.pallas_call(
        kernel,
        out_shape=jax.ShapeDtypeStruct((N, D, Sl), jnp.float32),
        grid_spec=pltpu.PrefetchScalarGridSpec(
            num_scalar_prefetch=0,
            grid=(N // nb,),
            in_specs=[
                pl.BlockSpec((nb, C_in, Sl), lambda n: (n, 0, 0)),
                pl.BlockSpec((nb, D, Sg), lambda n: (n, 0, 0)),
                pl.BlockSpec((Sg, Sl), lambda n: (0, 0)),
                pl.BlockSpec((D, C_in), lambda n: (0, 0)),
                pl.BlockSpec((D, 1), lambda n: (0, 0)),
                pl.BlockSpec((2 * D, D), lambda n: (0, 0)),
                pl.BlockSpec((2 * D, 1), lambda n: (0, 0)),
            ],
            out_specs=pl.BlockSpec((nb, D, Sl), lambda n: (n, 0, 0)),
        ),
        compiler_params=pltpu.CompilerParams(
            dimension_semantics=("parallel",),   # each batch block independent (v7x: 2 TCs)
        ),
    )(xl_f, xg_f, mT, w_l, b_l, w_ag, b_ag)

    return out_flat.reshape(N, D, Hl, Wl)


if __name__ == "__main__":
    # Small deterministic configuration: inp != oup (local_embedding = Conv1x1 + BN).
    N = 2
    inp, oup = 4, 8
    Hl, Wl = 16, 16          # local (target) spatial size -> Sl = 256 (lane-dense)
    Hg, Wg = 8, 8            # global spatial size, upsampled to (Hl, Wl)
    eps = 1e-5

    key = jax.random.PRNGKey(0)
    ks = jax.random.split(key, 17)
    x_l = jax.random.normal(ks[0], (N, inp, Hl, Wl), dtype=jnp.float32)
    x_g = jax.random.normal(ks[1], (N, oup, Hg, Wg), dtype=jnp.float32)

    def make_conv_bn(kw, kg, kb, km, kv, c_in, c_out):
        w = jax.random.normal(kw, (c_out, c_in), dtype=jnp.float32) * 0.1
        gamma = 1.0 + 0.1 * jax.random.normal(kg, (c_out,), dtype=jnp.float32)
        beta = 0.1 * jax.random.normal(kb, (c_out,), dtype=jnp.float32)
        mean = 0.1 * jax.random.normal(km, (c_out,), dtype=jnp.float32)
        var = jnp.abs(jax.random.normal(kv, (c_out,), dtype=jnp.float32)) + 0.5
        return w, gamma, beta, mean, var

    wl_raw, gl, bel, ml, vl = make_conv_bn(ks[2], ks[3], ks[4], ks[5], ks[6], inp, oup)
    wa_raw, ga, bea, ma, va = make_conv_bn(ks[7], ks[8], ks[9], ks[10], ks[11], oup, oup)
    wg_raw, gg, beg, mg, vg = make_conv_bn(ks[12], ks[13], ks[14], ks[15], ks[16], oup, oup)

    def fuse(w, gamma, beta, mean, var):
        scale = gamma / jnp.sqrt(var + eps)
        return scale[:, None] * w, beta - mean * scale

    wl_f, bl_f = fuse(wl_raw, gl, bel, ml, vl)
    wa_f, ba_f = fuse(wa_raw, ga, bea, ma, va)
    wg_f, bg_f = fuse(wg_raw, gg, beg, mg, vg)

    # Pure-JAX f32 reference reproducing the PyTorch forward.
    wh = _bilinear_interp_matrix(Hg, Hl)    # (Hl, Hg)
    ww = _bilinear_interp_matrix(Wg, Wl)    # (Wl, Wg)

    def conv_bn(x, w, b):
        return jnp.einsum("dc,nchw->ndhw", w, x) + b[None, :, None, None]

    local_feat = conv_bn(x_l, wl_f, bl_f)
    global_act = conv_bn(x_g, wa_f, ba_f)
    global_feat = conv_bn(x_g, wg_f, bg_f)
    sig = jnp.clip(global_act + 3.0, 0.0, 6.0) / 6.0
    sig_up = jnp.einsum("oh,nchw,pw->ncop", wh, sig, ww)
    feat_up = jnp.einsum("oh,nchw,pw->ncop", wh, global_feat, ww)
    ref = local_feat * sig_up + feat_up

    # f32 kernel: one batch element per grid step, batch axis parallel.
    out = injection_multi_sum(x_l, x_g, wl_f, bl_f, wa_f, ba_f, wg_f, bg_f,
                              nb=1, compute_dtype=jnp.float32)
    out = jax.block_until_ready(out)
    assert out.shape == (N, oup, Hl, Wl)
    np.testing.assert_allclose(np.asarray(out), np.asarray(ref), rtol=1e-4, atol=1e-4)

    # bf16-operand kernel (f32 accumulation), two batch elements per grid step.
    out_bf16 = injection_multi_sum(x_l, x_g, wl_f, bl_f, wa_f, ba_f, wg_f, bg_f,
                                   nb=2, compute_dtype=jnp.bfloat16)
    out_bf16 = jax.block_until_ready(out_bf16)
    np.testing.assert_allclose(np.asarray(out_bf16), np.asarray(ref), rtol=5e-2, atol=5e-2)

    print("KERNEL_OK")
</pallas_src>

<mosaic_0001>
module attributes {stable_mosaic.version = 11 : i64} {
  func.func @_injection_kernel(%arg0: i32, %arg1: memref<1x4x256xf32, #tpu.memory_space<vmem>>, %arg2: memref<1x8x64xf32, #tpu.memory_space<vmem>>, %arg3: memref<64x256xf32, #tpu.memory_space<vmem>>, %arg4: memref<8x4xf32, #tpu.memory_space<vmem>>, %arg5: memref<8x1xf32, #tpu.memory_space<vmem>>, %arg6: memref<16x8xf32, #tpu.memory_space<vmem>>, %arg7: memref<16x1xf32, #tpu.memory_space<vmem>>, %arg8: memref<1x8x256xf32, #tpu.memory_space<vmem>>) attributes {dimension_semantics = [#tpu.dimension_semantics<parallel>], iteration_bounds = array<i64: 2>, scalar_prefetch = 0 : i64, scratch_operands = 0 : i64, tpu.core_type = #tpu.core_type<tc>, window_params = [{transform_indices = @transform_0, window_bounds = array<i64: 1, 4, 256>}, {transform_indices = @transform_1, window_bounds = array<i64: 1, 8, 64>}, {pipeline_mode = #tpu.pipeline_mode<synchronous>, transform_indices = @transform_2, window_bounds = array<i64: 64, 256>}, {pipeline_mode = #tpu.pipeline_mode<synchronous>, transform_indices = @transform_3, window_bounds = array<i64: 8, 4>}, {pipeline_mode = #tpu.pipeline_mode<synchronous>, transform_indices = @transform_4, window_bounds = array<i64: 8, 1>}, {pipeline_mode = #tpu.pipeline_mode<synchronous>, transform_indices = @transform_5, window_bounds = array<i64: 16, 8>}, {pipeline_mode = #tpu.pipeline_mode<synchronous>, transform_indices = @transform_6, window_bounds = array<i64: 16, 1>}, {transform_indices = @transform_7, window_bounds = array<i64: 1, 8, 256>}]} {
    %c0 = arith.constant 0 : index
    %c0_0 = arith.constant 0 : index
    %0 = vector.load %arg3[%c0, %c0_0] : memref<64x256xf32, #tpu.memory_space<vmem>>, vector<64x256xf32>
    %c0_1 = arith.constant 0 : index
    %c0_2 = arith.constant 0 : index
    %1 = vector.load %arg4[%c0_1, %c0_2] : memref<8x4xf32, #tpu.memory_space<vmem>>, vector<8x4xf32>
    %c0_3 = arith.constant 0 : index
    %c0_4 = arith.constant 0 : index
    %2 = vector.load %arg5[%c0_3, %c0_4] : memref<8x1xf32, #tpu.memory_space<vmem>>, vector<8x1xf32>
    %c0_5 = arith.constant 0 : index
    %c0_6 = arith.constant 0 : index
    %3 = vector.load %arg6[%c0_5, %c0_6] : memref<16x8xf32, #tpu.memory_space<vmem>>, vector<16x8xf32>
    %c0_7 = arith.constant 0 : index
    %c0_8 = arith.constant 0 : index
    %4 = vector.load %arg7[%c0_7, %c0_8] : memref<16x1xf32, #tpu.memory_space<vmem>>, vector<16x1xf32>
    %c0_9 = arith.constant 0 : index
    %c0_10 = arith.constant 0 : index
    %c0_11 = arith.constant 0 : index
    %5 = vector.load %arg1[%c0_9, %c0_10, %c0_11] : memref<1x4x256xf32, #tpu.memory_space<vmem>>, vector<1x4x256xf32>
    %6 = vector.shape_cast %5 : vector<1x4x256xf32> to vector<4x256xf32>
    %c0_12 = arith.constant 0 : index
    %c0_13 = arith.constant 0 : index
    %c0_14 = arith.constant 0 : index
    %7 = vector.load %arg2[%c0_12, %c0_13, %c0_14] : memref<1x8x64xf32, #tpu.memory_space<vmem>>, vector<1x8x64xf32>
    %8 = vector.shape_cast %7 : vector<1x8x64xf32> to vector<8x64xf32>
    %cst = arith.constant dense<0.000000e+00> : vector<8x256xf32>
    %9 = tpu.matmul %1, %6, %cst {dimension_numbers = #tpu.dot_dimension_numbers<[1], [0], [0], [1], [0, 0, 1, 1], [], []>} : vector<8x4xf32>, vector<4x256xf32>, vector<8x256xf32> -> vector<8x256xf32>
    %10 = vector.broadcast %2 : vector<8x1xf32> to vector<8x256xf32>
    %11 = arith.addf %9, %10 : vector<8x256xf32>
    %cst_15 = arith.constant dense<0.000000e+00> : vector<16x64xf32>
    %12 = tpu.matmul %3, %8, %cst_15 {dimension_numbers = #tpu.dot_dimension_numbers<[1], [0], [0], [1], [0, 0, 1, 1], [], []>} : vector<16x8xf32>, vector<8x64xf32>, vector<16x64xf32> -> vector<16x64xf32>
    %13 = vector.broadcast %4 : vector<16x1xf32> to vector<16x64xf32>
    %14 = arith.addf %12, %13 : vector<16x64xf32>
    %15 = tpu.iota {dimensions = array<i32: 0>} : vector<16x64xi32>
    %cst_16 = arith.constant 3.000000e+00 : f32
    %16 = vector.broadcast %cst_16 : f32 to vector<16x64xf32>
    %17 = arith.addf %14, %16 : vector<16x64xf32>
    %cst_17 = arith.constant 0.000000e+00 : f32
    %cst_18 = arith.constant 6.000000e+00 : f32
    %18 = vector.broadcast %cst_17 : f32 to vector<16x64xf32>
    %19 = arith.maximumf %18, %17 : vector<16x64xf32>
    %20 = vector.broadcast %cst_18 : f32 to vector<16x64xf32>
    %21 = arith.minimumf %20, %19 : vector<16x64xf32>
    %cst_19 = arith.constant 0.166666672 : f32
    %22 = vector.broadcast %cst_19 : f32 to vector<16x64xf32>
    %23 = arith.mulf %21, %22 : vector<16x64xf32>
    %c8_i32 = arith.constant 8 : i32
    %24 = vector.broadcast %c8_i32 : i32 to vector<16x64xi32>
    %25 = arith.cmpi slt, %15, %24 : vector<16x64xi32>
    %26 = arith.select %25, %23, %14 : vector<16x64xi1>, vector<16x64xf32>
    %cst_20 = arith.constant dense<0.000000e+00> : vector<16x256xf32>
    %27 = tpu.matmul %26, %0, %cst_20 {dimension_numbers = #tpu.dot_dimension_numbers<[1], [0], [0], [1], [0, 0, 1, 1], [], []>} : vector<16x64xf32>, vector<64x256xf32>, vector<16x256xf32> -> vector<16x256xf32>
    %28 = vector.extract_strided_slice %27 {offsets = [0, 0], sizes = [8, 256], strides = [1, 1]} : vector<16x256xf32> to vector<8x256xf32>
    %29 = vector.extract_strided_slice %27 {offsets = [8, 0], sizes = [8, 256], strides = [1, 1]} : vector<16x256xf32> to vector<8x256xf32>
    %30 = arith.mulf %11, %28 : vector<8x256xf32>
    %31 = arith.addf %30, %29 : vector<8x256xf32>
    %c0_21 = arith.constant 0 : index
    %c0_22 = arith.constant 0 : index
    %c0_23 = arith.constant 0 : index
    %32 = vector.load %arg8[%c0_21, %c0_22, %c0_23] : memref<1x8x256xf32, #tpu.memory_space<vmem>>, vector<1x8x256xf32>
    %33 = vector.shape_cast %32 : vector<1x8x256xf32> to vector<8x256xf32>
    %34 = vector.shape_cast %31 : vector<8x256xf32> to vector<1x8x256xf32>
    tpu.vector_store %arg8[%c0_21, %c0_22, %c0_23], %34 {strides = array<i32>} : memref<1x8x256xf32, #tpu.memory_space<vmem>>, vector<1x8x256xf32>,
    return
  }
  func.func @transform_0(%arg0: i32) -> (i32, i32, i32) {
    %c0_i32 = arith.constant 0 : i32
    %c0_i32_0 = arith.constant 0 : i32
    %c0_i32_1 = arith.constant 0 : i32
    return %arg0, %c0_i32, %c0_i32_0 : i32, i32, i32
  }
  func.func @transform_1(%arg0: i32) -> (i32, i32, i32) {
    %c0_i32 = arith.constant 0 : i32
    %c0_i32_0 = arith.constant 0 : i32
    %c0_i32_1 = arith.constant 0 : i32
    return %arg0, %c0_i32, %c0_i32_0 : i32, i32, i32
  }
  func.func @transform_2(%arg0: i32) -> (i32, i32) {
    %c0_i32 = arith.constant 0 : i32
    %c0_i32_0 = arith.constant 0 : i32
    %c0_i32_1 = arith.constant 0 : i32
    return %c0_i32, %c0_i32_0 : i32, i32
  }
  func.func @transform_3(%arg0: i32) -> (i32, i32) {
    %c0_i32 = arith.constant 0 : i32
    %c0_i32_0 = arith.constant 0 : i32
    %c0_i32_1 = arith.constant 0 : i32
    return %c0_i32, %c0_i32_0 : i32, i32
  }
  func.func @transform_4(%arg0: i32) -> (i32, i32) {
    %c0_i32 = arith.constant 0 : i32
    %c0_i32_0 = arith.constant 0 : i32
    %c0_i32_1 = arith.constant 0 : i32
    return %c0_i32, %c0_i32_0 : i32, i32
  }
  func.func @transform_5(%arg0: i32) -> (i32, i32) {
    %c0_i32 = arith.constant 0 : i32
    %c0_i32_0 = arith.constant 0 : i32
    %c0_i32_1 = arith.constant 0 : i32
    return %c0_i32, %c0_i32_0 : i32, i32
  }
  func.func @transform_6(%arg0: i32) -> (i32, i32) {
    %c0_i32 = arith.constant 0 : i32
    %c0_i32_0 = arith.constant 0 : i32
    %c0_i32_1 = arith.constant 0 : i32
    return %c0_i32, %c0_i32_0 : i32, i32
  }
  func.func @transform_7(%arg0: i32) -> (i32, i32, i32) {
    %c0_i32 = arith.constant 0 : i32
    %c0_i32_0 = arith.constant 0 : i32
    %c0_i32_1 = arith.constant 0 : i32
    return %arg0, %c0_i32, %c0_i32_0 : i32, i32, i32
  }
}

</mosaic_0001>

<bundles_post_ra>
// kernel: tpu_custom_call.1
= control target key start
LH: loop header
LB: loop body
LE: loop exit
PB: predicated region body
PF: predicated region fallthrough
CT: control target
= control target key end

     0   :  { %12 = vsyncpa [#allocation3], 0  ;;  %s1084_s0 = inlined_call_operand.vmem [shape: f32[2,4,256], index: 0, kind: input, shape index: {}]   ;;  %s1085_s1 = inlined_call_operand.vmem [shape: f32[2,8,64], index: 1, kind: input, shape index: {}]   ;;  %s1086_s2 = inlined_call_operand.hbm [shape: f32[64,256], index: 2, kind: input, shape index: {}]   ;;  %s1087_s3 = inlined_call_operand.vmem [shape: f32[8,4], index: 3, kind: input, shape index: {}]   ;;  %s1088_s4 = inlined_call_operand.vmem [shape: f32[8,1], index: 4, kind: input, shape index: {}]   ;;  %s1089_s5 = inlined_call_operand.vmem [shape: f32[16,8], index: 5, kind: input, shape index: {}]   ;;  %s1090_s6 = inlined_call_operand.vmem [shape: f32[16,1], index: 6, kind: input, shape index: {}]   ;;  %s1091_s7 = inlined_call_operand.hbm [shape: f32[2,8,256], index: 7, kind: output, shape index: {}]  }
   0x1   :  { %13 = vsyncpa [#allocation4], 0 }
   0x2   :  { %15 = vsyncpa [#allocation4 + $0x1], 0  ;;  %s958_s24 = smov 0   ;;  %s960_s25 = smov 0  }
   0x3   :  { %s962_s26 = smov 0   ;;  %s964_s27 = smov 0  }
   0x4 LB: > { %s979_s28 = sadd.s32 4294967295, %s910_s27   ;;  %s715_s29 = sadd.s32 4294967294, %s910_s27   ;;  %s910_s27 = sphi %s964_s27, %s1099_s27   ;;  %s906_s26 = sphi %s962_s26, %s1098_s26   ;;  %s902_s25 = sphi %s960_s25, %s1097_s25   ;;  %s898_s24 = sphi %s958_s24, %s1096_s24  }
   0x5   : > { %s983_s30 = sadd.s32 1, %s910_s27   ;;  %s185_s8 = sadd.s32 1, %s906_s26 }
   0x6   : > { %s182_s9 = ssub.s32 %s910_s27, %s983_s30  ;;  %p195_p0 = scmp.ne.s32.totalorder %s906_s26, %s902_s25 }
   0x7   : > { %p183_p1 = scmp.eq.s32.totalorder %s182_s9, 0  ;;  %p196_p2 = scmp.eq.s32.totalorder %s979_s28, 1 }
   0x8   : > { %p201_p3 = scmp.ne.s32.totalorder %s902_s25, %s898_s24  ;;  %p202_p4 = scmp.eq.s32.totalorder %s715_s29, 1 }
   0x9   : > { %s994_s10 = scalar_select %p183_p1, %s906_s26, %s185_s8  }
   0xa   : > { %p996_p5 = por %p196_p2, %p195_p0  ;;  %p1000_p6 = por %p202_p4, %p201_p3 }
   0xb   : > { %p716_p7 = scmp.ge.s32.totalorder %s910_s27, 1  ;;  %p209_p8 = scmp.lt.s32.totalorder %s910_s27, 3 }
   0xc   : > { %s1093_s12 = scalar_select %p1000_p6, 1, 0 }
   0xd   : > { %p777_p9 = scmp.eq.s32.totalorder %s979_s28, 0  ;;  %p1007_p10 = pnand %p716_p7, %p209_p8 }
   0xe   : > { %s912_s14 = smov [#allocation2]  }
   0xf   : > { %s221_s15 = sshll.u32 %s912_s14, 4  ;;  %p769_p11 = pneg %p1007_p10  ;;  %s222_s15 = int_to_ptr.vmem [resolvable:$true] %s221_s15 }
  0x10   : > { %s831_s16 = scalar_lea.vmem %s222_s15, 2048  ;;  %p839_p3 = scmp.lt.s32.totalorder %s222_s15, %s222_s15 }
  0x11   : > { %p770_p12 = pnand %p777_p9, %p769_p11  ;;  %p832_p0 = scmp.ne.s32.totalorder %s222_s15, %s831_s16 }
  0x12   : > { %p840_p4 = scmp.lt.s32.totalorder %s831_s16, %s831_s16 }
  0x13   : > { %p822_p13 = pneg %p770_p12 }
  0x14   : > { %p841_p6 = por %p840_p4, %p839_p3 }
  0x15   : > { %p834_p1 = pnand %p832_p0, %p822_p13 }
  0x17   : > { %p835_p2 = pneg %p834_p1 }
  0x19   : > { %p842_p7 = pnand %p841_p6, %p835_p2 }
  0x1b   : > { %845 = shalt.err (!%p842_p7)
}
  0x1c   : > { %s913_s17 = smov 256   ;;  %s914_s18 = smov 16  }
  0x1d   : > { %772 = dma.hbm_to_vmem [thread:$0]  (!%p770_p12), %s1086_s2, 2048, %s222_s15, [#allocation3], %s913_s17, %s913_s17, %s914_s18  }
  0x1e   : > { %264 = sbr.rel (%p1007_p10) target bundleno = 462 (0x1ce), region = 48 }
  0x23   : > { %889 = dma.done.wait (%p777_p9), [#allocation3], 2048  }
  0x24   : > { %891 = vsyncadd (%p777_p9), [#allocation3], 4294965248  ;;  %p300_p8 = scmp.lt.s32.totalorder %s979_s28, 1  ;;  %v915_v0 = vmov 0   ;;  %v916_v1 = vmov 0.0   ;;  %vm430_vm0 = vcmask 64512  }
  0x25   : > { %817 = vset.pattern.permute.xlu0 %v915_v0  ;;  %818 = vset.pattern.permute.xlu1 %v915_v0  ;;  %v327_v3 = vld [vmem:[%s1089_s5] sm:$0xff]  ;;  %v328_v4 = vld [vmem:[%s1089_s5 + $0x8] sm:$0xff]  ;;  %v324_v6 = vld [vmem:[#allocation2 + $0x78] sm:$0xff]  ;;  %vm344_vm1 = vcmask 1043456   ;;  %vm340_vm2 = vcmask 31744   ;;  %vm527_vm3 = vcmask 523264  }
  0x26   : > { %s301_s21 = scalar_select %p300_p8, %s979_s28, 1  ;;  %413 = vmatprep.mubr.f32.mxu0 %v916_v1  ;;  %744 = vmatprep.mubr.msk.f32.mxu1 %vm430_vm0, %v327_v3  ;;  %v329_v5 = vld [vmem:[%s1090_s6] sm:$0xff]  ;;  %v323_v7 = vld [vmem:[#allocation2 + $0x70] sm:$0xff]  ;;  %v322_v8 = vld [vmem:[#allocation2 + $0x68] sm:$0xff] }
  0x27   : > { %422 = vperm.xlu0 %817, %v329_v5   ;;  %v330_v9 = vld [vmem:[%s1090_s6 + $0x8] sm:$0xff]  ;;  %v321_v10 = vld [vmem:[#allocation2 + $0x60] sm:$0xff]  ;;  %v320_v11 = vld [vmem:[#allocation2 + $0x58] sm:$0xff]  ;;  %s297_s13 = sand.u32 1, %s902_s25   ;;  %s738_s15 = sshll.u32 %s979_s28, 8 }
  0x28   : > { %s737_s22 = sshll.u32 %s301_s21, 3  ;;  %v319_v13 = vld [vmem:[#allocation2 + $0x50] sm:$0xff]  ;;  %v318_v15 = vld [vmem:[#allocation2 + $0x48] sm:$0xff]  ;;  %v325_v16 = vld [vmem:[%s1087_s3] sm:$0xff]  ;;  %s721_s14 = sshll.u32 %s297_s13, 4 }
  0x29   : > { %s308_s8 = scalar_lea.vmem %s1085_s1, %s737_s22  ;;  %s304_s20 = scalar_lea.vmem %s1084_s0, %s737_s22  ;;  %v317_v17 = vld [vmem:[#allocation2 + $0x40] sm:$0xff]  ;;  %v316_v18 = vld [vmem:[#allocation2 + $0x38] sm:$0xff]  ;;  %v315_v19 = vld [vmem:[#allocation2 + $0x30] sm:$0xff] }
  0x2a   : > { %v332_v2 = vld [vmem:[%s308_s8] sm:$0xff]  ;;  %v314_v20 = vld [vmem:[#allocation2 + $0x28] sm:$0xff]  ;;  %v312_v22 = vld [vmem:[#allocation2 + $0x18] sm:$0xff]  ;;  %s299_s16 = scalar_lea.vmem [#allocation5], %s721_s14  ;;  %s618_s21 = scalar_lea.sflag [#allocation4], %s297_s13 }
  0x2b   : > { %742 = vmatprep.subr.mxu1 %v332_v2  ;;  %v331_v12 = vld [vmem:[%s304_s20] sm:$0xff]  ;;  %427 = vperm.xlu0 %817, %v330_v9   ;;  %v311_v23 = vld [vmem:[#allocation2 + $0x10] sm:$0xff]  ;;  %v310_v24 = vld [vmem:[#allocation2 + $0x8] sm:$0xff]  ;;  %s632_s17 = sshll.u32 %s299_s16, 4  ;;  %s630_s20 = scalar_lea.hbm %s1091_s7, %s738_s15  ;;  %s633_s17 = int_to_ptr.vmem [resolvable:$true] %s632_s17 }
  0x2c   : > { %743 = vmatpush3.msra.mxu1 %v332_v2  ;;  %v339_v14 = vcombine.high %v331_v12, %v331_v12  ;;  %v313_v21 = vld [vmem:[#allocation2 + $0x20] sm:$0xff]  ;;  %s846_s23 = scalar_lea.vmem %s633_s17, 256  ;;  %s917_s28 = smov [#allocation5]  }
  0x2d   : > { %745 = vmatmul.mubr.msk.f32.vlgmr.msra.gmra.mxu1 %vm430_vm0, %v328_v4  ;;  %747 = vmatprep.subr.mxu1 %v324_v6  ;;  %v309_v25 = vld [vmem:[#allocation2] sm:$0xff]  ;;  %p847_p6 = scmp.ne.s32.totalorder %s633_s17, %s846_s23  ;;  %s850_s22 = sshll.u32 %s917_s28, 4  ;;  %s851_s22 = int_to_ptr.vmem [resolvable:$false] %s850_s22 }
  0x2e   : > { %755 = vmatpush1.msra.mxu1 %v323_v7  ;;  %604 = vmatprep.mubr.f32.mxu1 %v916_v1  ;;  %v326_v26 = vld [vmem:[%s1088_s4] sm:$0xff]  ;;  %s852_s29 = scalar_lea.vmem %s851_s22, 512  ;;  %p853_p11 = scmp.lt.s32.totalorder %s633_s17, %s851_s22 }
  0x2f   : > { %748 = vmatprep.subr.mxu1 %v322_v8  ;;  %725 = vmatprep.subr.msk.mxu0 %vm344_vm1, %v339_v14  ;;  %p848_p9 = pnand %p847_p6, %p996_p5  ;;  %p854_p12 = scmp.lt.s32.totalorder %s852_s29, %s846_s23 }
  0x30   : > { %756 = vmatpush1.msra.mxu1 %v321_v10  ;;  %726 = vmatpush1.msk.msra.mxu0 %vm344_vm1, %v331_v12 }
  0x31   : > { %749 = vmatprep.subr.mxu1 %v320_v11  ;;  %727 = vmatmul.mubr.msk.f32.vlgmr.msra.gmra.mxu0 %vm340_vm2, %v325_v16  ;;  %p849_p10 = pneg %p848_p9  ;;  %p855_p13 = por %p854_p12, %p853_p11 }
  0x32   : > { %757 = vmatpush1.msra.mxu1 %v319_v13  ;;  %550 = vmatprep.subr.mxu0 %v324_v6 }
  0x33   : > { %750 = vmatprep.subr.mxu1 %v318_v15  ;;  %551 = vmatpush1.msra.mxu0 %v323_v7  ;;  %p856_p0 = pnand %p855_p13, %p849_p10 }
  0x34   : > { %758 = vmatpush1.msra.mxu1 %v317_v17  ;;  %552 = vmatprep.subr.mxu0 %v322_v8 }
  0x35   : > { %751 = vmatprep.subr.mxu1 %v316_v18  ;;  %553 = vmatpush1.msra.mxu0 %v321_v10 }
  0x36   : > { %759 = vmatpush1.msra.mxu1 %v315_v19  ;;  %554 = vmatprep.subr.mxu0 %v320_v11 }
  0x37   : > { %752 = vmatprep.subr.mxu1 %v314_v20  ;;  %555 = vmatpush1.msra.mxu0 %v319_v13 }
  0x38   : > { %760 = vmatpush1.msra.mxu1 %v313_v21  ;;  %556 = vmatprep.subr.mxu0 %v318_v15 }
  0x39   : > { %753 = vmatprep.subr.mxu1 %v312_v22  ;;  %598 = vmatprep.mubr.f32.mxu0 %v916_v1 }
  0x3a   : > { %557 = vmatpush1.msra.mxu0 %v317_v17  ;;  %761 = vmatpush1.msra.mxu1 %v311_v23 }
  0x3b   : > { %558 = vmatprep.subr.mxu0 %v316_v18  ;;  %754 = vmatprep.subr.mxu1 %v310_v24 }
  0x3c   : > { %559 = vmatpush1.msra.mxu0 %v315_v19  ;;  %762 = vmatpush1.msra.mxu1 %v309_v25 }
  0x3d   : > { %560 = vmatprep.subr.mxu0 %v314_v20  ;;  %335 = vperm.xlu1 %818, %v326_v26  }
  0x3e   : > { %561 = vmatpush1.msra.mxu0 %v313_v21 }
  0x3f   : > { %562 = vmatprep.subr.mxu0 %v312_v22 }
  0x40   : > { %563 = vmatpush1.msra.mxu0 %v311_v23 }
  0x41   : > { %564 = vmatprep.subr.mxu0 %v310_v24 }
  0x42   : > { %565 = vmatpush1.msra.mxu0 %v309_v25 }
  0xa2   : > { %v423_v27 = vpop.permute.xlu0 %422 }
  0xa6   : > { %v428_v28 = vpop.permute.xlu0 %427 }
  0xb8   : > { %v336_v38 = vpop.permute.xlu1 %335 }
  0xed   : > { %v746_v29 = vpop.f32.mrf.mxu1 }
  0xee   : > { %v509_v30 = vadd.f32 %v746_v29, %v428_v28 }
  0xef   : > { %v503_v31 = vpop.f32.mrf.mxu1 }
  0xf0   : > { %v504_v32 = vadd.f32 %v503_v31, %v423_v27  ;;  %731 = vmatmul.mubr.msk.f32.vlgmr.msra.gmra.mxu1 %vm527_vm3, %v509_v30 }
  0xf1   : > { %v415_v37 = vpop.f32.mrf.mxu0 }
  0xf2   : > { %v515_v33 = vadd.f32 3.0, %v504_v32  ;;  %v416_v40 = vadd.f32 %v415_v37, %v336_v38 }
  0xf3   : > { %v417_v39 = vpop.f32.mrf.mxu0 }
  0xf4   : > { %v517_v34 = vmax.f32 %v515_v33, 0.0  ;;  %v418_v43 = vadd.f32 %v417_v39, %v336_v38 }
  0xf6   : > { %v519_v35 = vmin.f32 %v517_v34, 6.0 }
  0xf8   : > { %v521_v36 = vmul.f32 0.16666667, %v519_v35 }
  0xfa   : > { %730 = vmatmul.mubr.msk.f32.vlgmr.msra.gmra.mxu0 %vm527_vm3, %v521_v36 }
 0x1b0   : > { %v606_v41 = vpop.f32.mrf.mxu1 }
 0x1b2   : > { %v608_v48 = vpop.f32.mrf.mxu1 }
 0x1ba   : > { %v600_v42 = vpop.f32.mrf.mxu0 }
 0x1bb   : > { %v611_v44 = vmul.f32 %v600_v42, %v416_v40 }
 0x1bc   : > { %v602_v45 = vpop.f32.mrf.mxu0 }
 0x1bd   : > { %v613_v46 = vadd.f32 %v611_v44, %v606_v41  ;;  %v612_v47 = vmul.f32 %v602_v45, %v418_v43 }
 0x1bf   : > { %615 = vst [vmem:[%s299_s16] sm:$0xff] %v613_v46  ;;  %v614_v49 = vadd.f32 %v612_v47, %v608_v48 }
 0x1c1   : > { %616 = vst [vmem:[%s299_s16 + $0x8] sm:$0xff] %v614_v49 }
 0x1c2   : > { %859 = shalt.err (!%p856_p0)
}
 0x1c3   : > { %s860_s8 = scalar_lea.hbm %s630_s20, 256  ;;  %s864_s14 = scalar_lea.hbm %s1091_s7, 512 }
 0x1c4   : > { %p861_p1 = scmp.ne.s32.totalorder %s630_s20, %s860_s8  ;;  %p865_p4 = scmp.lt.s32.totalorder %s630_s20, %s1091_s7 }
 0x1c5   : > { %p866_p7 = scmp.lt.s32.totalorder %s864_s14, %s860_s8 }
 0x1c6   : > { %p862_p2 = pnand %p861_p1, %p996_p5 }
 0x1c7   : > { %p867_p8 = por %p866_p7, %p865_p4 }
 0x1c8   : > { %p863_p3 = pneg %p862_p2 }
 0x1ca   : > { %p868_p6 = pnand %p867_p8, %p863_p3 }
 0x1cc   : > { %871 = shalt.err (!%p868_p6)
}
 0x1cd   : > { %767 = dma.vmem_to_hbm [thread:$0]  (%p996_p5), %s633_s17, 256, %s630_s20, %s618_s21  }
 0x1ce PF: > { %p779_p9 = scmp.ge.s32.totalorder %s910_s27, 2  ;;  %s644_s18 = sand.u32 1, %s898_s24  }
 0x1cf   : > { %p1095_p10 = scmp.ne.s32.totalorder %s1093_s12, 0  ;;  %s645_s19 = scalar_lea.sflag [#allocation4], %s644_s18 }
 0x1d1   : > { %p774_p11 = pnand %p779_p9, %p1095_p10 }
 0x1d3   : > { %p775_p12 = pneg %p774_p11 }
 0x1d5   : > { %893 = dma.done.wait (%p775_p12), %s645_s19, 256  }
 0x1d6   : > { %895 = vsyncadd (%p775_p12), %s645_s19, 4294967040  ;;  %p18_p13 = scmp.ge.s32.totalorder %s983_s30, 4   ;;  %s1096_s24 = smov %s902_s25 }
 0x1d7   : > { %s1097_s25 = smov %s906_s26  ;;  %s1098_s26 = smov %s994_s10 }
 0x1d8   : > { %s1099_s27 = smov %s983_s30  ;;  %20 = sbr.rel (!%p18_p13) target bundleno = 4 (0x4), region = 91 }
 0x1dd   :  { %650 = vsyncpa [#allocation3], 1 }
 0x1de   :  { %652 = vsyncpa [#allocation3 + $0x1], 1 }
 0x1df   :  { %653 = vsyncpa [#allocation4], 1 }
 0x1e0   :  { %655 = vsyncpa [#allocation4 + $0x1], 1 }

</bundles_post_ra>
